<compile_context>
chip_gen: v7x
topology: tpu7x:2x2x1
jax: 0.10.0
libtpu: 0.0.40
codegen_flags: <defaults>
</compile_context>

<pallas_src>
import numpy as np
import jax
import jax.numpy as jnp
from jax.experimental import pallas as pl
from jax.experimental.pallas import tpu as pltpu

_EPS = 1e-5


def _round_up(x, m):
    return ((x + m - 1) // m) * m


# ----------------------------- Pallas kernels ------------------------------

def _mm_kernel(a_ref, b_ref, o_ref, acc_ref):
    @pl.when(pl.program_id(2) == 0)
    def _init():
        acc_ref[...] = jnp.zeros_like(acc_ref)

    acc_ref[...] += jnp.dot(a_ref[...], b_ref[...], preferred_element_type=jnp.float32)

    @pl.when(pl.program_id(2) == pl.num_programs(2) - 1)
    def _fin():
        o_ref[...] = acc_ref[...].astype(o_ref.dtype)


def _mm_affine_relu_kernel(a_ref, b_ref, scale_ref, shift_ref, o_ref, acc_ref):
    # Tiled matmul with fused (BN-fold scale/shift + ReLU) epilogue at the last K step.
    @pl.when(pl.program_id(2) == 0)
    def _init():
        acc_ref[...] = jnp.zeros_like(acc_ref)

    acc_ref[...] += jnp.dot(a_ref[...], b_ref[...], preferred_element_type=jnp.float32)

    @pl.when(pl.program_id(2) == pl.num_programs(2) - 1)
    def _fin():
        y = acc_ref[...] * scale_ref[...] + shift_ref[...]
        o_ref[...] = jnp.maximum(y, 0.0).astype(o_ref.dtype)


def _mm_residual_kernel(a_ref, b_ref, res_ref, o_ref, acc_ref):
    # Tiled matmul with fused residual add (shortcut) epilogue at the last K step.
    @pl.when(pl.program_id(2) == 0)
    def _init():
        acc_ref[...] = jnp.zeros_like(acc_ref)

    acc_ref[...] += jnp.dot(a_ref[...], b_ref[...], preferred_element_type=jnp.float32)

    @pl.when(pl.program_id(2) == pl.num_programs(2) - 1)
    def _fin():
        o_ref[...] = (acc_ref[...] + res_ref[...]).astype(o_ref.dtype)


def _bn_relu_kernel(x_ref, scale_ref, shift_ref, o_ref):
    # Fused affine batch-norm (folded scale/shift) + ReLU on the VPU; f32 math, bf16 out.
    y = x_ref[...].astype(jnp.float32) * scale_ref[...] + shift_ref[...]
    o_ref[...] = jnp.maximum(y, 0.0).astype(o_ref.dtype)


# ----------------------------- kernel wrappers ------------------------------

def _mm_tiles(M, K, N):
    # Conservative tile budget: fits double-buffered bf16 inputs + f32 acc well under
    # 32 MiB scoped VMEM on all generations (v5e/v6e/v7x).
    tm = min(256, _round_up(M, 16))
    tk = min(512, _round_up(K, 128))
    tn = min(256, _round_up(N, 128))
    return tm, tk, tn


def _tiled_matmul(a_bf16, b_bf16, *, scale=None, shift=None, residual=None,
                  out_dtype=jnp.float32):
    """a: (M, K) bf16, b: (K, N) bf16 -> (M, N) out_dtype, f32 accumulate on MXU.

    Optional fused epilogues (applied at the last K step):
      * scale/shift (per-N f32) + ReLU        (conv followed by BN+ReLU)
      * residual    ((M, N) f32) add          (conv followed by + shortcut)
    """
    M, K = a_bf16.shape
    _, N = b_bf16.shape
    tm, tk, tn = _mm_tiles(M, K, N)
    Mp, Kp, Np = _round_up(M, tm), _round_up(K, tk), _round_up(N, tn)

    a_p = jnp.pad(a_bf16.astype(jnp.bfloat16), ((0, Mp - M), (0, Kp - K)))
    b_p = jnp.pad(b_bf16.astype(jnp.bfloat16), ((0, Kp - K), (0, Np - N)))

    grid = (Mp // tm, Np // tn, Kp // tk)
    a_spec = pl.BlockSpec((tm, tk), lambda i, j, k: (i, k))
    b_spec = pl.BlockSpec((tk, tn), lambda i, j, k: (k, j))
    o_spec = pl.BlockSpec((tm, tn), lambda i, j, k: (i, j))
    cparams = pltpu.CompilerParams(
        dimension_semantics=("parallel", "parallel", "arbitrary"))
    scratch = [pltpu.VMEM((tm, tn), jnp.float32)]
    out_shape = jax.ShapeDtypeStruct((Mp, Np), out_dtype)

    if scale is not None:
        sc = jnp.pad(scale.astype(jnp.float32).reshape(1, N), ((0, 0), (0, Np - N)))
        sh = jnp.pad(shift.astype(jnp.float32).reshape(1, N), ((0, 0), (0, Np - N)))
        v_spec = pl.BlockSpec((1, tn), lambda i, j, k: (0, j))
        out = pl.pallas_call(
            _mm_affine_relu_kernel, out_shape=out_shape, grid=grid,
            in_specs=[a_spec, b_spec, v_spec, v_spec], out_specs=o_spec,
            scratch_shapes=scratch, compiler_params=cparams,
        )(a_p, b_p, sc, sh)
    elif residual is not None:
        res_p = jnp.pad(residual.astype(jnp.float32), ((0, Mp - M), (0, Np - N)))
        r_spec = pl.BlockSpec((tm, tn), lambda i, j, k: (i, j))
        out = pl.pallas_call(
            _mm_residual_kernel, out_shape=out_shape, grid=grid,
            in_specs=[a_spec, b_spec, r_spec], out_specs=o_spec,
            scratch_shapes=scratch, compiler_params=cparams,
        )(a_p, b_p, res_p)
    else:
        out = pl.pallas_call(
            _mm_kernel, out_shape=out_shape, grid=grid,
            in_specs=[a_spec, b_spec], out_specs=o_spec,
            scratch_shapes=scratch, compiler_params=cparams,
        )(a_p, b_p)
    return out[:M, :N]


def pallas_bn_relu(x_nhwc, scale, shift, out_dtype=jnp.bfloat16):
    """Tiled fused BN(affine-folded)+ReLU over row blocks; bf16 output feeds the MXU."""
    N, H, W, C = x_nhwc.shape
    M = N * H * W
    tr = min(512, _round_up(M, 16))
    Mp, Cp = _round_up(M, tr), _round_up(C, 128)
    x2 = jnp.pad(x_nhwc.reshape(M, C).astype(jnp.float32), ((0, Mp - M), (0, Cp - C)))
    sc = jnp.pad(scale.astype(jnp.float32).reshape(1, C), ((0, 0), (0, Cp - C)))
    sh = jnp.pad(shift.astype(jnp.float32).reshape(1, C), ((0, 0), (0, Cp - C)))
    out = pl.pallas_call(
        _bn_relu_kernel,
        out_shape=jax.ShapeDtypeStruct((Mp, Cp), out_dtype),
        grid=(Mp // tr,),
        in_specs=[pl.BlockSpec((tr, Cp), lambda i: (i, 0)),
                  pl.BlockSpec((1, Cp), lambda i: (0, 0)),
                  pl.BlockSpec((1, Cp), lambda i: (0, 0))],
        out_specs=pl.BlockSpec((tr, Cp), lambda i: (i, 0)),
        compiler_params=pltpu.CompilerParams(dimension_semantics=("parallel",)),
    )(x2, sc, sh)
    return out[:M, :C].reshape(N, H, W, C)


def pallas_conv_fused(x_nhwc, w_oihw, stride, padding, *, bn_scale=None, bn_shift=None,
                      residual_nhwc=None, out_dtype=jnp.float32):
    """Conv2d (no bias, PyTorch semantics) lowered to bf16 im2col + tiled fused matmul."""
    N, H, W, Cin = x_nhwc.shape
    Cout, _, KH, KW = w_oihw.shape
    x_bf = x_nhwc.astype(jnp.bfloat16)
    xp = jnp.pad(x_bf, ((0, 0), (padding, padding), (padding, padding), (0, 0)))
    Hout = (H + 2 * padding - KH) // stride + 1
    Wout = (W + 2 * padding - KW) // stride + 1
    patches = [xp[:, dy:dy + stride * Hout:stride, dx:dx + stride * Wout:stride, :]
               for dy in range(KH) for dx in range(KW)]
    im2col = jnp.concatenate(patches, axis=-1).reshape(N * Hout * Wout, KH * KW * Cin)
    wmat = jnp.transpose(w_oihw, (2, 3, 1, 0)).reshape(KH * KW * Cin, Cout)
    res = None
    if residual_nhwc is not None:
        res = residual_nhwc.reshape(N * Hout * Wout, Cout)
    out = _tiled_matmul(im2col, wmat.astype(jnp.bfloat16),
                        scale=bn_scale, shift=bn_shift, residual=res,
                        out_dtype=out_dtype)
    return out.reshape(N, Hout, Wout, Cout)


# ------------------------- functional basic block --------------------------

def _fold_bn(gamma, beta, mean, var):
    scale = gamma * jax.lax.rsqrt(var + _EPS)
    shift = beta - mean * scale
    return scale, shift


def f_basic_block_forward(x_nhwc, params, buffers, grads, coef, in_planes, out_planes, stride):
    """WideResNet BasicBlock with fast weights theta - coef * grad (eval-mode BN)."""
    equal_in_out = (in_planes == out_planes)

    def fw(name):
        return params[name] - coef * grads[name]

    scale1, shift1 = _fold_bn(fw("bn1.weight"), fw("bn1.bias"),
                              buffers["bn1.running_mean"], buffers["bn1.running_var"])
    scale2, shift2 = _fold_bn(fw("bn2.weight"), fw("bn2.bias"),
                              buffers["bn2.running_mean"], buffers["bn2.running_var"])

    a1 = pallas_bn_relu(x_nhwc, scale1, shift1)                  # relu(bn1(x)), bf16

    if equal_in_out:
        shortcut = x_nhwc.astype(jnp.float32)
    else:
        shortcut = pallas_conv_fused(a1, fw("convShortcut.weight"), stride, 0,
                                     out_dtype=jnp.float32)

    # conv1 with bn2+relu fused into the matmul epilogue (bf16 out -> feeds conv2 MXU).
    h = pallas_conv_fused(a1, fw("conv1.weight"), stride, 1,
                          bn_scale=scale2, bn_shift=shift2, out_dtype=jnp.bfloat16)
    # conv2 with the residual add fused into the matmul epilogue.
    out = pallas_conv_fused(h, fw("conv2.weight"), 1, 1,
                            residual_nhwc=shortcut, out_dtype=jnp.float32)
    return out


# ----------------------------- F_NetworkBlock ------------------------------

class FNetworkBlockPallas:
    def __init__(self, nb_layers, in_planes, out_planes, stride):
        self.nb_layers = int(nb_layers)
        self.layer_cfgs = [
            ((in_planes if i == 0 else out_planes), out_planes, (stride if i == 0 else 1))
            for i in range(self.nb_layers)
        ]

    def forward(self, out, m, block_lst_param_names, block_lst_buffers_names, coef, grads):
        # out: NCHW (PyTorch convention) -> NHWC internally.
        x = jnp.transpose(out, (0, 2, 3, 1)).astype(jnp.float32)
        n_layers = np.unique(np.array(block_lst_param_names)[:, 2]).shape[0]
        assert n_layers == len(self.layer_cfgs), (n_layers, len(self.layer_cfgs))
        for layer in range(n_layers):
            lp = [tuple(n) for n in block_lst_param_names if n[2] == str(layer)]
            lb = [tuple(n) for n in block_lst_buffers_names if n[2] == str(layer)]
            layer_params = {n[3]: m["/".join(n)] for n in lp}
            layer_grads = {n[3]: grads["/".join(n)] for n in lp}
            layer_buffers = {n[3]: m["/".join(n)] for n in lb}
            cin, cout, s = self.layer_cfgs[layer]
            x = f_basic_block_forward(x, layer_params, layer_buffers, layer_grads,
                                      coef, cin, cout, s)
        return jnp.transpose(x, (0, 3, 1, 2))


# --------------------------------- setup -----------------------------------

def _init_state(key, layer_cfgs):
    m, grads, pnames, bnames = {}, {}, [], []
    prefix = ("block", "layer")
    for i, (cin, cout, _) in enumerate(layer_cfgs):
        specs = [("bn1.weight", (cin,)), ("bn1.bias", (cin,)),
                 ("conv1.weight", (cout, cin, 3, 3)),
                 ("bn2.weight", (cout,)), ("bn2.bias", (cout,)),
                 ("conv2.weight", (cout, cout, 3, 3))]
        if cin != cout:
            specs.append(("convShortcut.weight", (cout, cin, 1, 1)))
        for pname, shape in specs:
            key, k1, k2 = jax.random.split(key, 3)
            full = prefix + (str(i), pname)
            if pname.startswith("bn") and pname.endswith("weight"):
                val = 1.0 + 0.05 * jax.random.normal(k1, shape, jnp.float32)
            elif pname.startswith("bn"):
                val = 0.05 * jax.random.normal(k1, shape, jnp.float32)
            else:
                val = 0.1 * jax.random.normal(k1, shape, jnp.float32)
            m["/".join(full)] = val
            grads["/".join(full)] = 0.01 * jax.random.normal(k2, shape, jnp.float32)
            pnames.append(list(full))
        for bname, shape in [("bn1.running_mean", (cin,)), ("bn1.running_var", (cin,)),
                             ("bn2.running_mean", (cout,)), ("bn2.running_var", (cout,))]:
            key, k1 = jax.random.split(key)
            full = prefix + (str(i), bname)
            if bname.endswith("var"):
                val = 1.0 + 0.1 * jnp.abs(jax.random.normal(k1, shape, jnp.float32))
            else:
                val = 0.05 * jax.random.normal(k1, shape, jnp.float32)
            m["/".join(full)] = val
            bnames.append(list(full))
    return m, grads, pnames, bnames, key


if __name__ == "__main__":
    nb_layers, in_planes, out_planes, stride = 2, 4, 8, 2
    batch, spatial = 2, 8

    block = FNetworkBlockPallas(nb_layers, in_planes, out_planes, stride)

    key = jax.random.PRNGKey(0)
    m, grads, pnames, bnames, key = _init_state(key, block.layer_cfgs)
    key, kx = jax.random.split(key)
    x = jax.random.normal(kx, (batch, in_planes, spatial, spatial), jnp.float32)  # NCHW
    coef = jnp.float32(0.1)

    out = block.forward(x, m, pnames, bnames, coef, grads)
    out = jax.block_until_ready(out)

    expected = (batch, out_planes, spatial // stride, spatial // stride)
    assert out.shape == expected, (out.shape, expected)
    assert jnp.all(jnp.isfinite(out))
    print("KERNEL_OK")
</pallas_src>

<mosaic_0001>
module attributes {stable_mosaic.version = 11 : i64} {
  func.func @_bn_relu_kernel(%arg0: i32, %arg1: memref<128x128xf32, #tpu.memory_space<vmem>>, %arg2: memref<1x128xf32, #tpu.memory_space<vmem>>, %arg3: memref<1x128xf32, #tpu.memory_space<vmem>>, %arg4: memref<128x128xbf16, #tpu.memory_space<vmem>>) attributes {dimension_semantics = [#tpu.dimension_semantics<parallel>], iteration_bounds = array<i64: 1>, scalar_prefetch = 0 : i64, scratch_operands = 0 : i64, tpu.core_type = #tpu.core_type<tc>, window_params = [{transform_indices = @transform_0, window_bounds = array<i64: 128, 128>}, {pipeline_mode = #tpu.pipeline_mode<synchronous>, transform_indices = @transform_1, window_bounds = array<i64: 1, 128>}, {pipeline_mode = #tpu.pipeline_mode<synchronous>, transform_indices = @transform_2, window_bounds = array<i64: 1, 128>}, {transform_indices = @transform_3, window_bounds = array<i64: 128, 128>}]} {
    %c0 = arith.constant 0 : index
    %c0_0 = arith.constant 0 : index
    %0 = vector.load %arg1[%c0, %c0_0] : memref<128x128xf32, #tpu.memory_space<vmem>>, vector<128x128xf32>
    %c0_1 = arith.constant 0 : index
    %c0_2 = arith.constant 0 : index
    %1 = vector.load %arg2[%c0_1, %c0_2] : memref<1x128xf32, #tpu.memory_space<vmem>>, vector<1x128xf32>
    %2 = vector.broadcast %1 : vector<1x128xf32> to vector<128x128xf32>
    %3 = arith.mulf %0, %2 : vector<128x128xf32>
    %c0_3 = arith.constant 0 : index
    %c0_4 = arith.constant 0 : index
    %4 = vector.load %arg3[%c0_3, %c0_4] : memref<1x128xf32, #tpu.memory_space<vmem>>, vector<1x128xf32>
    %5 = vector.broadcast %4 : vector<1x128xf32> to vector<128x128xf32>
    %6 = arith.addf %3, %5 : vector<128x128xf32>
    %cst = arith.constant 0.000000e+00 : f32
    %7 = vector.broadcast %cst : f32 to vector<128x128xf32>
    %8 = arith.maximumf %6, %7 : vector<128x128xf32>
    %9 = arith.truncf %8 : vector<128x128xf32> to vector<128x128xbf16>
    %c0_5 = arith.constant 0 : index
    %c0_6 = arith.constant 0 : index
    %10 = vector.load %arg4[%c0_5, %c0_6] : memref<128x128xbf16, #tpu.memory_space<vmem>>, vector<128x128xbf16>
    tpu.vector_store %arg4[%c0_5, %c0_6], %9 {strides = array<i32>} : memref<128x128xbf16, #tpu.memory_space<vmem>>, vector<128x128xbf16>,
    return
  }
  func.func @transform_0(%arg0: i32) -> (i32, i32) {
    %c0_i32 = arith.constant 0 : i32
    %c0_i32_0 = arith.constant 0 : i32
    return %arg0, %c0_i32 : i32, i32
  }
  func.func @transform_1(%arg0: i32) -> (i32, i32) {
    %c0_i32 = arith.constant 0 : i32
    %c0_i32_0 = arith.constant 0 : i32
    %c0_i32_1 = arith.constant 0 : i32
    return %c0_i32, %c0_i32_0 : i32, i32
  }
  func.func @transform_2(%arg0: i32) -> (i32, i32) {
    %c0_i32 = arith.constant 0 : i32
    %c0_i32_0 = arith.constant 0 : i32
    %c0_i32_1 = arith.constant 0 : i32
    return %c0_i32, %c0_i32_0 : i32, i32
  }
  func.func @transform_3(%arg0: i32) -> (i32, i32) {
    %c0_i32 = arith.constant 0 : i32
    %c0_i32_0 = arith.constant 0 : i32
    return %arg0, %c0_i32 : i32, i32
  }
}

</mosaic_0001>

<bundles_post_ra>
// kernel: tpu_custom_call.1
= control target key start
LH: loop header
LB: loop body
LE: loop exit
PB: predicated region body
PF: predicated region fallthrough
CT: control target
= control target key end

     0   :  { %8 = vsyncpa [#allocation3], 0  ;;  %s431_s0 = inlined_call_operand.hbm [shape: f32[128,128], index: 0, kind: input, shape index: {}]   ;;  %s432_s1 = inlined_call_operand.vmem [shape: f32[1,128], index: 1, kind: input, shape index: {}]   ;;  %s433_s2 = inlined_call_operand.vmem [shape: f32[1,128], index: 2, kind: input, shape index: {}]   ;;  %s434_s3 = inlined_call_operand.hbm [shape: bf16[128,128], index: 3, kind: output, shape index: {}]  }
   0x1   :  { %9 = vsyncpa [#allocation4], 0  ;;  %s339_s12 = smov [#allocation2]   ;;  %s291_s16 = scalar_lea.hbm %s431_s0, 2048 }
   0x2   :  { %s15_s13 = sshll.u32 %s339_s12, 4  ;;  %p292_p0 = scmp.ne.s32.totalorder %s431_s0, %s291_s16  ;;  %s16_s13 = int_to_ptr.vmem [resolvable:$true] %s15_s13 }
   0x3   :  { %p295_p1 = scmp.lt.u32.totalorder %s291_s16, %s431_s0 }
   0x5   :  { %p297_p2 = pnand %p295_p1, %p292_p0 }
   0x7   :  { %300 = shalt.err (!%p297_p2)
}
   0x8   :  { %s301_s21 = scalar_lea.vmem %s16_s13, 2048  ;;  %p306_p4 = scmp.lt.s32.totalorder %s16_s13, %s16_s13 }
   0x9   :  { %p302_p3 = scmp.ne.s32.totalorder %s16_s13, %s301_s21  ;;  %p307_p5 = scmp.lt.s32.totalorder %s301_s21, %s301_s21 }
   0xb   :  { %p308_p6 = por %p307_p5, %p306_p4 }
   0xd   :  { %p309_p7 = pnand %p308_p6, %p302_p3 }
   0xf   :  { %312 = shalt.err (!%p309_p7)
}
  0x10   :  { %s340_s22 = smov 128   ;;  %s341_s23 = smov 8  }
  0x11   :  { %21 = dma.hbm_to_vmem [thread:$0]  %s431_s0, 2048, %s16_s13, [#allocation3], %s340_s22, %s340_s22, %s341_s23  }
  0x12   :  { %335 = dma.done.wait [#allocation3], 2048  }
  0x13   :  { %336 = vsyncadd [#allocation3], 4294965248  ;;  %v29_v0 = vld [vmem:[#allocation2] sm:$0xff]  ;;  %v30_v1 = vld [vmem:[#allocation2 + $0x8] sm:$0xff]  ;;  %s342_s0 = smov [#allocation5]  }
  0x14   :  { %v380_v2 = vld [vmem:[%s432_s1] ss:$0 sm:$0xff]  ;;  %v31_v6 = vld [vmem:[#allocation2 + $0x10] sm:$0xff]  ;;  %v32_v7 = vld [vmem:[#allocation2 + $0x18] sm:$0xff]  ;;  %s192_s1 = sshll.u32 %s342_s0, 4  ;;  %s193_s1 = int_to_ptr.vmem [resolvable:$true] %s192_s1 }
  0x15   :  { %v52_v3 = vmul.f32 %v380_v2, %v29_v0  ;;  %v53_v4 = vmul.f32 %v380_v2, %v30_v1  ;;  %v387_v5 = vld [vmem:[%s433_s2] ss:$0 sm:$0xff]  ;;  %v54_v8 = vmul.f32 %v380_v2, %v31_v6  ;;  %v55_v9 = vmul.f32 %v380_v2, %v32_v7  ;;  %v34_v11 = vld [vmem:[#allocation2 + $0x28] sm:$0xff]  ;;  %v35_v12 = vld [vmem:[#allocation2 + $0x30] sm:$0xff]  ;;  %s313_s2 = scalar_lea.vmem %s193_s1, 1024  ;;  %p318_p9 = scmp.lt.s32.totalorder %s193_s1, %s193_s1 }
  0x16   :  { %v33_v10 = vld [vmem:[#allocation2 + $0x20] sm:$0xff]  ;;  %v57_v16 = vmul.f32 %v380_v2, %v34_v11  ;;  %v36_v17 = vld [vmem:[#allocation2 + $0x38] sm:$0xff]  ;;  %v58_v20 = vmul.f32 %v380_v2, %v35_v12  ;;  %v38_v27 = vld [vmem:[#allocation2 + $0x48] sm:$0xff]  ;;  %p314_p8 = scmp.ne.s32.totalorder %s193_s1, %s313_s2  ;;  %p319_p10 = scmp.lt.s32.totalorder %s313_s2, %s313_s2 }
  0x17   :  { %v75_v13 = vadd.f32 %v387_v5, %v52_v3  ;;  %v76_v14 = vadd.f32 %v387_v5, %v53_v4  ;;  %v56_v15 = vmul.f32 %v380_v2, %v33_v10  ;;  %v77_v18 = vadd.f32 %v387_v5, %v54_v8  ;;  %v37_v22 = vld [vmem:[#allocation2 + $0x40] sm:$0xff]  ;;  %v39_v32 = vld [vmem:[#allocation2 + $0x50] sm:$0xff]  ;;  %v40_v33 = vld [vmem:[#allocation2 + $0x58] sm:$0xff] }
  0x18   :  { %v78_v19 = vadd.f32 %v387_v5, %v55_v9  ;;  %v59_v21 = vmul.f32 %v380_v2, %v36_v17  ;;  %v80_v26 = vadd.f32 %v387_v5, %v57_v16  ;;  %v81_v30 = vadd.f32 %v387_v5, %v58_v20  ;;  %v41_v38 = vld [vmem:[#allocation2 + $0x60] sm:$0xff]  ;;  %v42_v39 = vld [vmem:[#allocation2 + $0x68] sm:$0xff]  ;;  %v43_v44 = vld [vmem:[#allocation2 + $0x70] sm:$0xff]  ;;  %p320_p11 = por %p319_p10, %p318_p9 }
  0x19   :  { %v91_v23 = vmax.f32 %v75_v13, 0.0  ;;  %v92_v24 = vmax.f32 %v76_v14, 0.0  ;;  %v79_v25 = vadd.f32 %v387_v5, %v56_v15  ;;  %v93_v28 = vmax.f32 %v77_v18, 0.0  ;;  %v44_v49 = vld [vmem:[#allocation2 + $0x78] sm:$0xff] }
  0x1a   :  { %v94_v29 = vmax.f32 %v78_v19, 0.0  ;;  %v82_v31 = vadd.f32 %v387_v5, %v59_v21  ;;  %v96_v36 = vmax.f32 %v80_v26, 0.0  ;;  %v60_v37 = vmul.f32 %v380_v2, %v37_v22  ;;  %p321_p12 = pnand %p320_p11, %p314_p8 }
  0x1b   :  { %v241_v34 = vpack.c.bf16 %v92_v24, %v91_v23  ;;  %v95_v35 = vmax.f32 %v79_v25, 0.0  ;;  %v97_v41 = vmax.f32 %v81_v30, 0.0  ;;  %v61_v43 = vmul.f32 %v380_v2, %v38_v27 }
  0x1c   :  { %v246_v40 = vpack.c.bf16 %v94_v29, %v93_v28  ;;  %v98_v42 = vmax.f32 %v82_v31, 0.0  ;;  %v83_v46 = vadd.f32 %v387_v5, %v60_v37  ;;  %v62_v47 = vmul.f32 %v380_v2, %v39_v32 }
  0x1d   :  { %242 = vst [vmem:[#allocation5] sm:$0xff] %v241_v34   ;;  %v251_v45 = vpack.c.bf16 %v96_v36, %v95_v35  ;;  %v63_v48 = vmul.f32 %v380_v2, %v40_v33  ;;  %v84_v51 = vadd.f32 %v387_v5, %v61_v43  ;;  %v64_v52 = vmul.f32 %v380_v2, %v41_v38 }
  0x1e   :  { %278 = vst [vmem:[#allocation5 + $0x8] sm:$0xff] %v246_v40   ;;  %v256_v50 = vpack.c.bf16 %v98_v42, %v97_v41  ;;  %v65_v53 = vmul.f32 %v380_v2, %v42_v39  ;;  %v99_v54 = vmax.f32 %v83_v46, 0.0  ;;  %v85_v55 = vadd.f32 %v387_v5, %v62_v47 }
  0x1f   :  { %279 = vst [vmem:[#allocation5 + $0x10] sm:$0xff] %v251_v45   ;;  %v86_v56 = vadd.f32 %v387_v5, %v63_v48  ;;  %v66_v57 = vmul.f32 %v380_v2, %v43_v44  ;;  %v100_v58 = vmax.f32 %v84_v51, 0.0  ;;  %v87_v59 = vadd.f32 %v387_v5, %v64_v52 }
  0x20   :  { %280 = vst [vmem:[#allocation5 + $0x18] sm:$0xff] %v256_v50   ;;  %v88_v60 = vadd.f32 %v387_v5, %v65_v53  ;;  %v67_v61 = vmul.f32 %v380_v2, %v44_v49  ;;  %v101_v62 = vmax.f32 %v85_v55, 0.0 }
  0x21   :  { %v102_v63 = vmax.f32 %v86_v56, 0.0  ;;  %v89_v0 = vadd.f32 %v387_v5, %v66_v57  ;;  %v261_v1 = vpack.c.bf16 %v100_v58, %v99_v54  ;;  %v103_v3 = vmax.f32 %v87_v59, 0.0 }
  0x22   :  { %v104_v4 = vmax.f32 %v88_v60, 0.0  ;;  %v90_v6 = vadd.f32 %v387_v5, %v67_v61 }
  0x23   :  { %v266_v7 = vpack.c.bf16 %v102_v63, %v101_v62  ;;  %v105_v8 = vmax.f32 %v89_v0, 0.0  ;;  %281 = vst [vmem:[#allocation5 + $0x20] sm:$0xff] %v261_v1  }
  0x24   :  { %v271_v9 = vpack.c.bf16 %v104_v4, %v103_v3  ;;  %v106_v10 = vmax.f32 %v90_v6, 0.0 }
  0x25   :  { %282 = vst [vmem:[#allocation5 + $0x28] sm:$0xff] %v266_v7  }
  0x26   :  { %283 = vst [vmem:[#allocation5 + $0x30] sm:$0xff] %v271_v9   ;;  %v276_v11 = vpack.c.bf16 %v106_v10, %v105_v8 }
  0x28   :  { %284 = vst [vmem:[#allocation5 + $0x38] sm:$0xff] %v276_v11  }
  0x29   :  { %324 = shalt.err (!%p321_p12)
}
  0x2a   :  { %s325_s5 = scalar_lea.hbm %s434_s3, 1024 }
  0x2b   :  { %p326_p13 = scmp.ne.s32.totalorder %s434_s3, %s325_s5  ;;  %p329_p0 = scmp.lt.u32.totalorder %s325_s5, %s434_s3 }
  0x2d   :  { %p331_p1 = pnand %p329_p0, %p326_p13 }
  0x2f   :  { %334 = shalt.err (!%p331_p1)
}
  0x30   :  { %s343_s10 = smov 64   ;;  %s344_s11 = smov 4  }
  0x31   :  { %198 = dma.vmem_to_hbm [thread:$0]  %s193_s1, 1024, %s434_s3, [#allocation4], %s343_s10, %s343_s10, %s344_s11  }
  0x32   :  { %337 = dma.done.wait [#allocation4], 1024  }
  0x33   :  { %338 = vsyncadd [#allocation4], 4294966272 }
  0x34   :  { %202 = vsyncpa [#allocation3], 1 }
  0x35   :  { %203 = vsyncpa [#allocation4], 1 }

</bundles_post_ra>
